<compile_context>
chip_gen: v7x
topology: tpu7x:2x2x1
jax: 0.10.0
libtpu: 0.0.40
codegen_flags: <defaults>
</compile_context>

<pallas_src>
import functools

import jax
import jax.numpy as jnp
from jax.experimental import pallas as pl
from jax.experimental.pallas import tpu as pltpu

K = 32                 # DIMw2 = K (input/output size of the optimizee MLP)
HIDDEN = 50            # hidden_sizew
PACK = 4               # rows packed per 128-lane vector (4 * 32 = 128)
KP = PACK * K          # 128  (packed feature width)
HP = PACK * HIDDEN     # 200  (packed hidden width)


def _round_up(n, m):
    return (n + m - 1) // m * m


def _mlp_kernel(x_ref, w1_ref, w2_ref, w3_ref, b1_ref, b2_ref, b3_ref, o_ref):
    # x: (tb4, 128) = 4 packed gradient rows per vector row.
    # w1: (128, 200), w2: (200, 200), w3: (200, 128) block-diagonal replicas.
    # b1/b2: (1, 200), b3: (1, 128) tiled biases.  o: (tb4, 128).
    x = x_ref[...]
    h1 = jnp.dot(x, w1_ref[...], preferred_element_type=jnp.float32) + b1_ref[...]
    h1 = jnp.maximum(h1, 0.0)                                  # ReLU
    h2 = jnp.dot(h1, w2_ref[...], preferred_element_type=jnp.float32) + b2_ref[...]
    h2 = jnp.maximum(h2, 0.0)                                  # ReLU
    o_ref[...] = (
        jnp.dot(h2, w3_ref[...], preferred_element_type=jnp.float32) + b3_ref[...]
    )


def pack_params(params):
    """Build the kernel-side parameter set (block-diag weights, tiled biases).

    Call once when the optimizee-network parameters change, NOT per forward —
    this is hoisted out of the per-call path per the perf review.
    """
    def block_diag4(w):
        # block_diag(w, w, w, w) via kron(eye(4), w): (m, n) -> (4m, 4n).
        return jnp.kron(jnp.eye(PACK, dtype=w.dtype), w)

    return {
        "w1": block_diag4(params["w1"]).astype(jnp.float32),          # (128, 200)
        "w2": block_diag4(params["w2"]).astype(jnp.float32),          # (200, 200)
        "w3": block_diag4(params["w3"]).astype(jnp.float32),          # (200, 128)
        "b1": jnp.tile(params["b1"].astype(jnp.float32), PACK).reshape(1, HP),
        "b2": jnp.tile(params["b2"].astype(jnp.float32), PACK).reshape(1, HP),
        "b3": jnp.tile(params["b3"].astype(jnp.float32), PACK).reshape(1, KP),
    }


@functools.partial(jax.jit, static_argnames=("tb",))
def optimizee_w_forward_batched(gradients, packed_params, *, tb=8192):
    """Row-wise Optimizee_w forward over a batch of gradients.

    gradients:     (B, K) float32
    packed_params: output of pack_params()
    tb:            row tile in ORIGINAL (32-wide) rows; default 8192 rows
                   => (2048, 128) f32 blocks (~1 MiB in + 1 MiB out per step).
    returns:       (B, K) float32
    """
    B, k = gradients.shape
    if k != K:
        raise ValueError(f"expected trailing dim {K}, got {k}")
    if B == 0:
        return jnp.zeros((0, K), jnp.float32)

    # Lane-pack 4 rows into one 128-lane row.  For B % 4 != 0 (rare in L2O —
    # parameter counts are normally multiples of 4) pad at most 3 rows.
    b_eff = B
    x = gradients
    if B % PACK != 0:
        pad = PACK - B % PACK
        x = jnp.pad(x, ((0, pad), (0, 0)))
        b_eff = B + pad
    b4 = b_eff // PACK
    xp = x.reshape(b4, KP)          # free: contiguous row-major relabel

    # Tile selection (in packed rows): multiple of 8 (f32 sublane), clamp to
    # the batch, and for big batches guarantee >=2 grid steps so v7x megacore
    # can shard the 'parallel' axis across both TensorCores.
    tb4 = _round_up(max(8, tb // PACK), 8)
    tb4 = min(tb4, _round_up(b4, 8))
    if b4 > 1024 and pl.cdiv(b4, tb4) < 2:
        tb4 = _round_up(pl.cdiv(b4, 2), 8)

    grid = (pl.cdiv(b4, tb4),)      # partial last block: masked on writeback

    out = pl.pallas_call(
        _mlp_kernel,
        out_shape=jax.ShapeDtypeStruct((b4, KP), jnp.float32),
        grid=grid,
        in_specs=[
            pl.BlockSpec((tb4, KP), lambda i: (i, 0)),    # streamed input rows
            pl.BlockSpec((KP, HP), lambda i: (0, 0)),     # w1, VMEM-resident
            pl.BlockSpec((HP, HP), lambda i: (0, 0)),     # w2, VMEM-resident
            pl.BlockSpec((HP, KP), lambda i: (0, 0)),     # w3, VMEM-resident
            pl.BlockSpec((1, HP), lambda i: (0, 0)),      # b1, resident
            pl.BlockSpec((1, HP), lambda i: (0, 0)),      # b2, resident
            pl.BlockSpec((1, KP), lambda i: (0, 0)),      # b3, resident
        ],
        out_specs=pl.BlockSpec((tb4, KP), lambda i: (i, 0)),
        compiler_params=pltpu.CompilerParams(
            # Megacore sharding on v7x; near-no-op on single-TC v5e/v6e.
            dimension_semantics=("parallel",)),
    )(
        xp,
        packed_params["w1"], packed_params["w2"], packed_params["w3"],
        packed_params["b1"], packed_params["b2"], packed_params["b3"],
    )

    out = out.reshape(b_eff, K)
    if b_eff != B:
        out = out[:B]
    return out


def optimizee_w_forward(gradient, params):
    """Matches Optimizee_w.forward: (K,) -> (K,).

    Per the perf review, a pallas_call over a single row is >100x launch /
    pipeline-setup overhead for ~11 KFLOP, so the single-gradient path is
    plain jnp (XLA fuses it).  The Pallas kernel is the batched path used by
    the real L2O workload.
    """
    x = gradient.reshape(1, K)
    h1 = jnp.maximum(x @ params["w1"] + params["b1"], 0.0)
    h2 = jnp.maximum(h1 @ params["w2"] + params["b2"], 0.0)
    return (h2 @ params["w3"] + params["b3"]).reshape(K)


def init_params(key):
    """Deterministic init mimicking torch.nn.Linear (uniform +-1/sqrt(fan_in)).

    Weights are stored as (in_features, out_features) so the math is x @ W.
    """
    k1, k2, k3, k4, k5, k6 = jax.random.split(key, 6)

    def lin(kw, kb, fan_in, fan_out):
        bound = 1.0 / jnp.sqrt(jnp.float32(fan_in))
        w = jax.random.uniform(kw, (fan_in, fan_out), jnp.float32, -bound, bound)
        b = jax.random.uniform(kb, (fan_out,), jnp.float32, -bound, bound)
        return w, b

    w1, b1 = lin(k1, k2, K, HIDDEN)        # fnn1: Linear(K, 50)
    w2, b2 = lin(k3, k4, HIDDEN, HIDDEN)   # fnn2: Linear(50, 50)
    w3, b3 = lin(k5, k6, HIDDEN, K)        # out : Linear(50, K)
    return {"w1": w1, "b1": b1, "w2": w2, "b2": b2, "w3": w3, "b3": b3}


if __name__ == "__main__":
    key = jax.random.PRNGKey(0)
    pkey, xkey, bkey = jax.random.split(key, 3)
    params = init_params(pkey)
    packed = pack_params(params)           # built once, outside the call path

    # Single-gradient path (original module semantics).
    gradient = jax.random.normal(xkey, (K,), jnp.float32)
    update = optimizee_w_forward(gradient, params)
    jax.block_until_ready(update)

    # Batched Pallas path.  B divisible by 4 (lane packing) but NOT by the row
    # tile, so the masked partial last block is exercised; the tb=256 call
    # forces a multi-step grid.
    B = 500
    grads = jax.random.normal(bkey, (B, K), jnp.float32)
    updates = optimizee_w_forward_batched(grads, packed)                 # 1 step
    updates_small_tile = optimizee_w_forward_batched(grads, packed, tb=256)  # 2 steps
    jax.block_until_ready((updates, updates_small_tile))

    # Plain-JAX reference of the same math.
    def ref_fn(x2d):
        h1 = jnp.maximum(x2d @ params["w1"] + params["b1"], 0.0)
        h2 = jnp.maximum(h1 @ params["w2"] + params["b2"], 0.0)
        return h2 @ params["w3"] + params["b3"]

    ref_single = ref_fn(gradient.reshape(1, K)).reshape(K)
    ref_batch = ref_fn(grads)

    assert update.shape == (K,)
    assert updates.shape == (B, K)
    assert updates_small_tile.shape == (B, K)
    assert jnp.allclose(update, ref_single, atol=1e-4, rtol=1e-4)
    assert jnp.allclose(updates, ref_batch, atol=1e-4, rtol=1e-4)
    assert jnp.allclose(updates_small_tile, ref_batch, atol=1e-4, rtol=1e-4)

    print("KERNEL_OK")
</pallas_src>

<mosaic_0001>
module attributes {stable_mosaic.version = 11 : i64} {
  func.func @_mlp_kernel(%arg0: i32, %arg1: memref<128x128xf32, #tpu.memory_space<vmem>>, %arg2: memref<128x200xf32, #tpu.memory_space<vmem>>, %arg3: memref<200x200xf32, #tpu.memory_space<vmem>>, %arg4: memref<200x128xf32, #tpu.memory_space<vmem>>, %arg5: memref<1x200xf32, #tpu.memory_space<vmem>>, %arg6: memref<1x200xf32, #tpu.memory_space<vmem>>, %arg7: memref<1x128xf32, #tpu.memory_space<vmem>>, %arg8: memref<128x128xf32, #tpu.memory_space<vmem>>) attributes {dimension_semantics = [#tpu.dimension_semantics<parallel>], iteration_bounds = array<i64: 1>, scalar_prefetch = 0 : i64, scratch_operands = 0 : i64, tpu.core_type = #tpu.core_type<tc>, window_params = [{transform_indices = @transform_0, window_bounds = array<i64: 128, 128>}, {pipeline_mode = #tpu.pipeline_mode<synchronous>, transform_indices = @transform_1, window_bounds = array<i64: 128, 200>}, {pipeline_mode = #tpu.pipeline_mode<synchronous>, transform_indices = @transform_2, window_bounds = array<i64: 200, 200>}, {pipeline_mode = #tpu.pipeline_mode<synchronous>, transform_indices = @transform_3, window_bounds = array<i64: 200, 128>}, {pipeline_mode = #tpu.pipeline_mode<synchronous>, transform_indices = @transform_4, window_bounds = array<i64: 1, 200>}, {pipeline_mode = #tpu.pipeline_mode<synchronous>, transform_indices = @transform_5, window_bounds = array<i64: 1, 200>}, {pipeline_mode = #tpu.pipeline_mode<synchronous>, transform_indices = @transform_6, window_bounds = array<i64: 1, 128>}, {transform_indices = @transform_7, window_bounds = array<i64: 128, 128>}]} {
    %c0 = arith.constant 0 : index
    %c0_0 = arith.constant 0 : index
    %0 = vector.load %arg1[%c0, %c0_0] : memref<128x128xf32, #tpu.memory_space<vmem>>, vector<128x128xf32>
    %c0_1 = arith.constant 0 : index
    %c0_2 = arith.constant 0 : index
    %1 = vector.load %arg2[%c0_1, %c0_2] : memref<128x200xf32, #tpu.memory_space<vmem>>, vector<128x200xf32>
    %cst = arith.constant dense<0.000000e+00> : vector<128x200xf32>
    %2 = tpu.matmul %0, %1, %cst {dimension_numbers = #tpu.dot_dimension_numbers<[1], [0], [0], [1], [0, 0, 1, 1], [], []>} : vector<128x128xf32>, vector<128x200xf32>, vector<128x200xf32> -> vector<128x200xf32>
    %c0_3 = arith.constant 0 : index
    %c0_4 = arith.constant 0 : index
    %3 = vector.load %arg5[%c0_3, %c0_4] : memref<1x200xf32, #tpu.memory_space<vmem>>, vector<1x200xf32>
    %4 = vector.broadcast %3 : vector<1x200xf32> to vector<128x200xf32>
    %5 = arith.addf %2, %4 : vector<128x200xf32>
    %cst_5 = arith.constant 0.000000e+00 : f32
    %6 = vector.broadcast %cst_5 : f32 to vector<128x200xf32>
    %7 = arith.maximumf %5, %6 : vector<128x200xf32>
    %c0_6 = arith.constant 0 : index
    %c0_7 = arith.constant 0 : index
    %8 = vector.load %arg3[%c0_6, %c0_7] : memref<200x200xf32, #tpu.memory_space<vmem>>, vector<200x200xf32>
    %cst_8 = arith.constant dense<0.000000e+00> : vector<128x200xf32>
    %9 = tpu.matmul %7, %8, %cst_8 {dimension_numbers = #tpu.dot_dimension_numbers<[1], [0], [0], [1], [0, 0, 1, 1], [], []>} : vector<128x200xf32>, vector<200x200xf32>, vector<128x200xf32> -> vector<128x200xf32>
    %c0_9 = arith.constant 0 : index
    %c0_10 = arith.constant 0 : index
    %10 = vector.load %arg6[%c0_9, %c0_10] : memref<1x200xf32, #tpu.memory_space<vmem>>, vector<1x200xf32>
    %11 = vector.broadcast %10 : vector<1x200xf32> to vector<128x200xf32>
    %12 = arith.addf %9, %11 : vector<128x200xf32>
    %cst_11 = arith.constant 0.000000e+00 : f32
    %13 = vector.broadcast %cst_11 : f32 to vector<128x200xf32>
    %14 = arith.maximumf %12, %13 : vector<128x200xf32>
    %c0_12 = arith.constant 0 : index
    %c0_13 = arith.constant 0 : index
    %15 = vector.load %arg4[%c0_12, %c0_13] : memref<200x128xf32, #tpu.memory_space<vmem>>, vector<200x128xf32>
    %cst_14 = arith.constant dense<0.000000e+00> : vector<128x128xf32>
    %16 = tpu.matmul %14, %15, %cst_14 {dimension_numbers = #tpu.dot_dimension_numbers<[1], [0], [0], [1], [0, 0, 1, 1], [], []>} : vector<128x200xf32>, vector<200x128xf32>, vector<128x128xf32> -> vector<128x128xf32>
    %c0_15 = arith.constant 0 : index
    %c0_16 = arith.constant 0 : index
    %17 = vector.load %arg7[%c0_15, %c0_16] : memref<1x128xf32, #tpu.memory_space<vmem>>, vector<1x128xf32>
    %18 = vector.broadcast %17 : vector<1x128xf32> to vector<128x128xf32>
    %19 = arith.addf %16, %18 : vector<128x128xf32>
    %c0_17 = arith.constant 0 : index
    %c0_18 = arith.constant 0 : index
    %20 = vector.load %arg8[%c0_17, %c0_18] : memref<128x128xf32, #tpu.memory_space<vmem>>, vector<128x128xf32>
    tpu.vector_store %arg8[%c0_17, %c0_18], %19 {strides = array<i32>} : memref<128x128xf32, #tpu.memory_space<vmem>>, vector<128x128xf32>,
    return
  }
  func.func @transform_0(%arg0: i32) -> (i32, i32) {
    %c0_i32 = arith.constant 0 : i32
    %c0_i32_0 = arith.constant 0 : i32
    return %arg0, %c0_i32 : i32, i32
  }
  func.func @transform_1(%arg0: i32) -> (i32, i32) {
    %c0_i32 = arith.constant 0 : i32
    %c0_i32_0 = arith.constant 0 : i32
    %c0_i32_1 = arith.constant 0 : i32
    return %c0_i32, %c0_i32_0 : i32, i32
  }
  func.func @transform_2(%arg0: i32) -> (i32, i32) {
    %c0_i32 = arith.constant 0 : i32
    %c0_i32_0 = arith.constant 0 : i32
    %c0_i32_1 = arith.constant 0 : i32
    return %c0_i32, %c0_i32_0 : i32, i32
  }
  func.func @transform_3(%arg0: i32) -> (i32, i32) {
    %c0_i32 = arith.constant 0 : i32
    %c0_i32_0 = arith.constant 0 : i32
    %c0_i32_1 = arith.constant 0 : i32
    return %c0_i32, %c0_i32_0 : i32, i32
  }
  func.func @transform_4(%arg0: i32) -> (i32, i32) {
    %c0_i32 = arith.constant 0 : i32
    %c0_i32_0 = arith.constant 0 : i32
    %c0_i32_1 = arith.constant 0 : i32
    return %c0_i32, %c0_i32_0 : i32, i32
  }
  func.func @transform_5(%arg0: i32) -> (i32, i32) {
    %c0_i32 = arith.constant 0 : i32
    %c0_i32_0 = arith.constant 0 : i32
    %c0_i32_1 = arith.constant 0 : i32
    return %c0_i32, %c0_i32_0 : i32, i32
  }
  func.func @transform_6(%arg0: i32) -> (i32, i32) {
    %c0_i32 = arith.constant 0 : i32
    %c0_i32_0 = arith.constant 0 : i32
    %c0_i32_1 = arith.constant 0 : i32
    return %c0_i32, %c0_i32_0 : i32, i32
  }
  func.func @transform_7(%arg0: i32) -> (i32, i32) {
    %c0_i32 = arith.constant 0 : i32
    %c0_i32_0 = arith.constant 0 : i32
    return %arg0, %c0_i32 : i32, i32
  }
}

</mosaic_0001>

<bundles_post_ra>
// kernel: optimizee_w_forward_batched.1
= control target key start
LH: loop header
LB: loop body
LE: loop exit
PB: predicated region body
PF: predicated region fallthrough
CT: control target
= control target key end

     0   :  { %v1005_v3 = vmov 0.0   ;;  %vm341_vm0 = vcmask 588800   ;;  %s1693_s1 = inlined_call_operand.vmem [shape: f32[128,200], index: 1, kind: input, shape index: {}]   ;;  %s1694_s2 = inlined_call_operand.vmem [shape: f32[200,200], index: 2, kind: input, shape index: {}]   ;;  %s1695_s0 = inlined_call_operand.vmem [shape: f32[125,128], index: 0, kind: input, shape index: {}]   ;;  %s1696_s3 = inlined_call_operand.vmem [shape: f32[200,128], index: 3, kind: input, shape index: {}]   ;;  %s1697_s4 = inlined_call_operand.vmem [shape: f32[1,200], index: 4, kind: input, shape index: {}]   ;;  %s1698_s5 = inlined_call_operand.vmem [shape: f32[1,200], index: 5, kind: input, shape index: {}]   ;;  %s1699_s6 = inlined_call_operand.vmem [shape: f32[1,128], index: 6, kind: input, shape index: {}]   ;;  %s1700_s7 = inlined_call_operand.vmem [shape: f32[125,128], index: 7, kind: output, shape index: {}]  }
   0x1   :  { %v43_v0 = vld [vmem:[%s1693_s1 + $0x8] sm:$0xff]  ;;  %v45_v1 = vld [vmem:[%s1693_s1 + $0x18] sm:$0xff]  ;;  %v42_v2 = vld [vmem:[%s1693_s1] sm:$0xff]  ;;  %150 = vmatprep.mubr.f32.mxu0 %v1005_v3 }
   0x2   :  { %v861_v4 = vpack.c.bf16 %v45_v1, %v43_v0  ;;  %v44_v5 = vld [vmem:[%s1693_s1 + $0x10] sm:$0xff]  ;;  %v47_v6 = vld [vmem:[%s1693_s1 + $0x28] sm:$0xff]  ;;  %v49_v7 = vld [vmem:[%s1693_s1 + $0x38] sm:$0xff] }
   0x3   :  { %v863_v8 = vpack.c.bf16 %v44_v5, %v42_v2  ;;  %v865_v9 = vpack.c.bf16 %v49_v7, %v47_v6  ;;  %v46_v10 = vld [vmem:[%s1693_s1 + $0x20] sm:$0xff]  ;;  %v48_v11 = vld [vmem:[%s1693_s1 + $0x30] sm:$0xff]  ;;  %v51_v12 = vld [vmem:[%s1693_s1 + $0x48] sm:$0xff] }
   0x4   :  { %862 = vmatprep.subr.bf16.mxu0 %v861_v4  ;;  %v53_v13 = vld [vmem:[%s1693_s1 + $0x58] sm:$0xff]  ;;  %v867_v14 = vpack.c.bf16 %v48_v11, %v46_v10  ;;  %v50_v16 = vld [vmem:[%s1693_s1 + $0x40] sm:$0xff]  ;;  %v52_v17 = vld [vmem:[%s1693_s1 + $0x50] sm:$0xff] }
   0x5   :  { %864 = vmatpush1.bf16.msra.mxu0 %v863_v8  ;;  %v869_v15 = vpack.c.bf16 %v53_v13, %v51_v12  ;;  %v55_v18 = vld [vmem:[%s1693_s1 + $0x68] sm:$0xff]  ;;  %v57_v19 = vld [vmem:[%s1693_s1 + $0x78] sm:$0xff]  ;;  %v871_v20 = vpack.c.bf16 %v52_v17, %v50_v16  ;;  %v54_v22 = vld [vmem:[%s1693_s1 + $0x60] sm:$0xff] }
   0x6   :  { %866 = vmatprep.subr.bf16.mxu0 %v865_v9  ;;  %v873_v21 = vpack.c.bf16 %v57_v19, %v55_v18  ;;  %v56_v23 = vld [vmem:[%s1693_s1 + $0x70] sm:$0xff]  ;;  %v59_v24 = vld [vmem:[%s1693_s1 + $0x88] sm:$0xff]  ;;  %v61_v25 = vld [vmem:[%s1693_s1 + $0x98] sm:$0xff] }
   0x7   :  { %v875_v26 = vpack.c.bf16 %v56_v23, %v54_v22  ;;  %v877_v27 = vpack.c.bf16 %v61_v25, %v59_v24  ;;  %v58_v28 = vld [vmem:[%s1693_s1 + $0x80] sm:$0xff]  ;;  %v60_v29 = vld [vmem:[%s1693_s1 + $0x90] sm:$0xff]  ;;  %v63_v30 = vld [vmem:[%s1693_s1 + $0xa8] sm:$0xff] }
   0x8   :  { %v65_v31 = vld [vmem:[%s1693_s1 + $0xb8] sm:$0xff]  ;;  %v62_v32 = vld [vmem:[%s1693_s1 + $0xa0] sm:$0xff]  ;;  %v64_v33 = vld [vmem:[%s1693_s1 + $0xb0] sm:$0xff]  ;;  %v879_v34 = vpack.c.bf16 %v60_v29, %v58_v28 }
   0x9   :  { %868 = vmatpush1.bf16.msra.mxu0 %v867_v14  ;;  %v67_v35 = vld [vmem:[%s1693_s1 + $0xc8] sm:$0xff]  ;;  %v69_v36 = vld [vmem:[%s1693_s1 + $0xd8] sm:$0xff]  ;;  %v279_v39 = vld [vmem:[%s1694_s2] sm:$0xff]  ;;  %v881_v40 = vpack.c.bf16 %v65_v31, %v63_v30  ;;  %v883_v51 = vpack.c.bf16 %v64_v33, %v62_v32 }
   0xa   :  { %870 = vmatprep.subr.bf16.mxu0 %v869_v15  ;;  %v280_v37 = vld [vmem:[%s1694_s2 + $0x8] sm:$0xff]  ;;  %v282_v38 = vld [vmem:[%s1694_s2 + $0x18] sm:$0xff]  ;;  %v281_v42 = vld [vmem:[%s1694_s2 + $0x10] sm:$0xff]  ;;  %v885_v55 = vpack.c.bf16 %v69_v36, %v67_v35 }
   0xb   :  { %v893_v41 = vpack.c.bf16 %v282_v38, %v280_v37  ;;  %v284_v43 = vld [vmem:[%s1694_s2 + $0x28] sm:$0xff]  ;;  %v286_v44 = vld [vmem:[%s1694_s2 + $0x38] sm:$0xff]  ;;  %v895_v45 = vpack.c.bf16 %v281_v42, %v279_v39  ;;  %v283_v47 = vld [vmem:[%s1694_s2 + $0x20] sm:$0xff] }
   0xc   :  { %v897_v46 = vpack.c.bf16 %v286_v44, %v284_v43  ;;  %v285_v48 = vld [vmem:[%s1694_s2 + $0x30] sm:$0xff]  ;;  %v288_v49 = vld [vmem:[%s1694_s2 + $0x48] sm:$0xff]  ;;  %v290_v50 = vld [vmem:[%s1694_s2 + $0x58] sm:$0xff] }
   0xd   :  { %872 = vmatpush1.bf16.msra.mxu0 %v871_v20  ;;  %894 = vmatprep.subr.bf16.mxu1 %v893_v41  ;;  %v66_v52 = vld [vmem:[%s1693_s1 + $0xc0] sm:$0xff]  ;;  %v68_v53 = vld [vmem:[%s1693_s1 + $0xd0] sm:$0xff]  ;;  %v899_v54 = vpack.c.bf16 %v285_v48, %v283_v47  ;;  %v71_v56 = vld [vmem:[%s1693_s1 + $0xe8] sm:$0xff]  ;;  %v901_v57 = vpack.c.bf16 %v290_v50, %v288_v49 }
   0xe   :  { %874 = vmatprep.subr.bf16.mxu0 %v873_v21  ;;  %896 = vmatpush1.bf16.msra.mxu1 %v895_v45  ;;  %v287_v58 = vld [vmem:[%s1694_s2 + $0x40] sm:$0xff]  ;;  %v289_v59 = vld [vmem:[%s1694_s2 + $0x50] sm:$0xff]  ;;  %v73_v60 = vld [vmem:[%s1693_s1 + $0xf8] sm:$0xff]  ;;  %v887_v63 = vpack.c.bf16 %v68_v53, %v66_v52 }
   0xf   :  { %898 = vmatprep.subr.bf16.mxu1 %v897_v46  ;;  %v292_v61 = vld [vmem:[%s1694_s2 + $0x68] sm:$0xff]  ;;  %v294_v62 = vld [vmem:[%s1694_s2 + $0x78] sm:$0xff]  ;;  %v70_v0 = vld [vmem:[%s1693_s1 + $0xe0] sm:$0xff]  ;;  %v903_v1 = vpack.c.bf16 %v289_v59, %v287_v58  ;;  %v889_v2 = vpack.c.bf16 %v73_v60, %v71_v56 }
  0x10   :  { %v72_v4 = vld [vmem:[%s1693_s1 + $0xf0] sm:$0xff]  ;;  %v905_v5 = vpack.c.bf16 %v294_v62, %v292_v61  ;;  %v291_v6 = vld [vmem:[%s1694_s2 + $0x60] sm:$0xff]  ;;  %v296_v8 = vld [vmem:[%s1694_s2 + $0x88] sm:$0xff] }
  0x11   :  { %876 = vmatpush1.bf16.msra.mxu0 %v875_v26  ;;  %v293_v7 = vld [vmem:[%s1694_s2 + $0x70] sm:$0xff]  ;;  %v298_v9 = vld [vmem:[%s1694_s2 + $0x98] sm:$0xff]  ;;  %v891_v10 = vpack.c.bf16 %v72_v4, %v70_v0  ;;  %v295_v13 = vld [vmem:[%s1694_s2 + $0x80] sm:$0xff] }
  0x12   :  { %878 = vmatprep.subr.bf16.mxu0 %v877_v27  ;;  %900 = vmatpush1.bf16.msra.mxu1 %v899_v54  ;;  %v907_v11 = vpack.c.bf16 %v293_v7, %v291_v6  ;;  %v909_v12 = vpack.c.bf16 %v298_v9, %v296_v8  ;;  %v297_v14 = vld [vmem:[%s1694_s2 + $0x90] sm:$0xff]  ;;  %v300_v15 = vld [vmem:[%s1694_s2 + $0xa8] sm:$0xff]  ;;  %v302_v16 = vld [vmem:[%s1694_s2 + $0xb8] sm:$0xff] }
  0x13   :  { %902 = vmatprep.subr.bf16.mxu1 %v901_v57  ;;  %v26_v17 = vld [vmem:[%s1695_s0] sm:$0xff]  ;;  %v911_v18 = vpack.c.bf16 %v297_v14, %v295_v13  ;;  %v913_v19 = vpack.c.bf16 %v302_v16, %v300_v15  ;;  %v301_v21 = vld [vmem:[%s1694_s2 + $0xb0] sm:$0xff]  ;;  %v304_v22 = vld [vmem:[%s1694_s2 + $0xc8] sm:$0xff]  ;;  %v1006_v13 = vmov 0.0|0.0  }
  0x14   :  { %v299_v20 = vld [vmem:[%s1694_s2 + $0xa0] sm:$0xff]  ;;  %v306_v23 = vld [vmem:[%s1694_s2 + $0xd8] sm:$0xff]  ;;  %v27_v24 = vld [vmem:[%s1695_s0 + $0x8] sm:$0xff] }
  0x15   :  { %880 = vmatpush1.bf16.msra.mxu0 %v879_v34  ;;  %v915_v25 = vpack.c.bf16 %v301_v21, %v299_v20  ;;  %v917_v26 = vpack.c.bf16 %v306_v23, %v304_v22  ;;  %v303_v27 = vld [vmem:[%s1694_s2 + $0xc0] sm:$0xff]  ;;  %v305_v28 = vld [vmem:[%s1694_s2 + $0xd0] sm:$0xff]  ;;  %v308_v29 = vld [vmem:[%s1694_s2 + $0xe8] sm:$0xff] }
  0x16   :  { %882 = vmatprep.subr.bf16.mxu0 %v881_v40  ;;  %904 = vmatpush1.bf16.msra.mxu1 %v903_v1  ;;  %v310_v30 = vld [vmem:[%s1694_s2 + $0xf8] sm:$0xff]  ;;  %v28_v31 = vld [vmem:[%s1695_s0 + $0x10] sm:$0xff]  ;;  %v919_v32 = vpack.c.bf16 %v305_v28, %v303_v27  ;;  %v307_v34 = vld [vmem:[%s1694_s2 + $0xe0] sm:$0xff] }
  0x17   :  { %906 = vmatprep.subr.bf16.mxu1 %v905_v5  ;;  %v921_v33 = vpack.c.bf16 %v310_v30, %v308_v29  ;;  %v309_v35 = vld [vmem:[%s1694_s2 + $0xf0] sm:$0xff]  ;;  %v312_v36 = vld [vmem:[%s1694_s2 + $0x108] sm:$0xff]  ;;  %v314_v37 = vld [vmem:[%s1694_s2 + $0x118] sm:$0xff] }
  0x18   :  { %v29_v38 = vld [vmem:[%s1695_s0 + $0x18] sm:$0xff]  ;;  %v923_v39 = vpack.c.bf16 %v309_v35, %v307_v34  ;;  %v925_v40 = vpack.c.bf16 %v314_v37, %v312_v36  ;;  %v311_v41 = vld [vmem:[%s1694_s2 + $0x100] sm:$0xff]  ;;  %v313_v42 = vld [vmem:[%s1694_s2 + $0x110] sm:$0xff] }
  0x19   :  { %884 = vmatpush1.bf16.msra.mxu0 %v883_v51  ;;  %v316_v43 = vld [vmem:[%s1694_s2 + $0x128] sm:$0xff]  ;;  %v318_v44 = vld [vmem:[%s1694_s2 + $0x138] sm:$0xff]  ;;  %v30_v45 = vld [vmem:[%s1695_s0 + $0x20] sm:$0xff]  ;;  %v927_v46 = vpack.c.bf16 %v313_v42, %v311_v41 }
  0x1a   :  { %886 = vmatprep.subr.bf16.mxu0 %v885_v55  ;;  %908 = vmatpush1.bf16.msra.mxu1 %v907_v11  ;;  %v929_v47 = vpack.c.bf16 %v318_v44, %v316_v43  ;;  %v315_v48 = vld [vmem:[%s1694_s2 + $0x120] sm:$0xff]  ;;  %v317_v49 = vld [vmem:[%s1694_s2 + $0x130] sm:$0xff]  ;;  %v320_v50 = vld [vmem:[%s1694_s2 + $0x148] sm:$0xff] }
  0x1b   :  { %910 = vmatprep.subr.bf16.mxu1 %v909_v12  ;;  %v322_v51 = vld [vmem:[%s1694_s2 + $0x158] sm:$0xff]  ;;  %v31_v52 = vld [vmem:[%s1695_s0 + $0x28] sm:$0xff]  ;;  %v931_v53 = vpack.c.bf16 %v317_v49, %v315_v48  ;;  %v319_v55 = vld [vmem:[%s1694_s2 + $0x140] sm:$0xff] }
  0x1c   :  { %v933_v54 = vpack.c.bf16 %v322_v51, %v320_v50  ;;  %v321_v56 = vld [vmem:[%s1694_s2 + $0x150] sm:$0xff]  ;;  %v33_v59 = vld [vmem:[%s1695_s0 + $0x38] sm:$0xff]  ;;  %v34_v60 = vld [vmem:[%s1695_s0 + $0x40] sm:$0xff] }
  0x1d   :  { %888 = vmatpush1.bf16.msra.mxu0 %v887_v63  ;;  %v32_v57 = vld [vmem:[%s1695_s0 + $0x30] sm:$0xff]  ;;  %v935_v58 = vpack.c.bf16 %v321_v56, %v319_v55  ;;  %v35_v61 = vld [vmem:[%s1695_s0 + $0x48] sm:$0xff]  ;;  %v37_v63 = vld [vmem:[%s1695_s0 + $0x58] sm:$0xff] }
  0x1e   :  { %890 = vmatprep.subr.bf16.mxu0 %v889_v2  ;;  %912 = vmatpush1.bf16.msra.mxu1 %v911_v18  ;;  %v36_v62 = vld [vmem:[%s1695_s0 + $0x50] sm:$0xff]  ;;  %v38_v0 = vld [vmem:[%s1695_s0 + $0x60] sm:$0xff]  ;;  %v39_v1 = vld [vmem:[%s1695_s0 + $0x68] sm:$0xff] }
  0x1f   :  { %914 = vmatprep.subr.bf16.mxu1 %v913_v19  ;;  %v40_v2 = vld [vmem:[%s1695_s0 + $0x70] sm:$0xff]  ;;  %v41_v4 = vld [vmem:[%s1695_s0 + $0x78] sm:$0xff]  ;;  %v324_v5 = vld [vmem:[%s1694_s2 + $0x168] sm:$0xff] }
  0x20   :  { %v326_v6 = vld [vmem:[%s1694_s2 + $0x178] sm:$0xff]  ;;  %v323_v8 = vld [vmem:[%s1694_s2 + $0x160] sm:$0xff]  ;;  %v325_v9 = vld [vmem:[%s1694_s2 + $0x170] sm:$0xff] }
  0x21   :  { %892 = vmatpush1.bf16.msra.mxu0 %v891_v10  ;;  %v937_v7 = vpack.c.bf16 %v326_v6, %v324_v5  ;;  %v939_v10 = vpack.c.bf16 %v325_v9, %v323_v8  ;;  %v328_v11 = vld [vmem:[%s1694_s2 + $0x188] sm:$0xff]  ;;  %v327_v12 = vld [vmem:[%s1694_s2 + $0x180] sm:$0xff]  ;;  %v585_v16 = vld [vmem:[%s1696_s3 + $0x10] sm:$0xff] }
  0x22   :  { %916 = vmatpush1.bf16.msra.mxu1 %v915_v25  ;;  %941 = vmatprep.subr.bf16.mxu0 %v1006_v13  ;;  %v583_v14 = vld [vmem:[%s1696_s3] sm:$0xff]  ;;  %v584_v15 = vld [vmem:[%s1696_s3 + $0x8] sm:$0xff]  ;;  %v586_v18 = vld [vmem:[%s1696_s3 + $0x18] sm:$0xff] }
  0x23   :  { %918 = vmatprep.subr.bf16.mxu1 %v917_v26  ;;  %v1374_v19 = vpack.c.bf16 %v586_v18, %v585_v16  ;;  %v587_v20 = vld [vmem:[%s1696_s3 + $0x20] sm:$0xff]  ;;  %v588_v21 = vld [vmem:[%s1696_s3 + $0x28] sm:$0xff]  ;;  %v589_v23 = vld [vmem:[%s1696_s3 + $0x30] sm:$0xff] }
  0x24   :  { %151 = vmatmul.mubr.f32.vlgmr.msra.gmra.mrb[0].mxu0 %v26_v17  ;;  %v1368_v17 = vpack.c.bf16 %v584_v15, %v583_v14  ;;  %v1384_v22 = vpack.c.bf16 %v588_v21, %v587_v20  ;;  %v591_v26 = vld [vmem:[%s1696_s3 + $0x40] sm:$0xff]  ;;  %v592_v27 = vld [vmem:[%s1696_s3 + $0x48] sm:$0xff]  ;;  %v593_v29 = vld [vmem:[%s1696_s3 + $0x50] sm:$0xff] }
  0x25   :  { %156 = vmatprep.mubr.f32.mxu0 %v1005_v3  ;;  %v1404_v28 = vpack.c.bf16 %v592_v27, %v591_v26  ;;  %v594_v30 = vld [vmem:[%s1696_s3 + $0x58] sm:$0xff]  ;;  %v597_v35 = vld [vmem:[%s1696_s3 + $0x70] sm:$0xff]  ;;  %v603_v44 = vld [vmem:[%s1696_s3 + $0xa0] sm:$0xff] }
  0x26   :  { %920 = vmatpush1.bf16.msra.mxu1 %v919_v32  ;;  %943 = vmatpush1.bf16.msra.mxu0 %v1368_v17  ;;  %v595_v32 = vld [vmem:[%s1696_s3 + $0x60] sm:$0xff]  ;;  %v598_v36 = vld [vmem:[%s1696_s3 + $0x78] sm:$0xff]  ;;  %v601_v41 = vld [vmem:[%s1696_s3 + $0x90] sm:$0xff] }
  0x27   :  { %922 = vmatprep.subr.bf16.mxu1 %v921_v33  ;;  %944 = vmatprep.subr.bf16.mxu0 %v1006_v13  ;;  %v596_v33 = vld [vmem:[%s1696_s3 + $0x68] sm:$0xff]  ;;  %v1434_v37 = vpack.c.bf16 %v598_v36, %v597_v35  ;;  %v602_v42 = vld [vmem:[%s1696_s3 + $0x98] sm:$0xff]  ;;  %v74_v50 = vld [vmem:[%s1697_s4] sm:$0x3] }
  0x28   :  { %157 = vmatmul.mubr.f32.gmra.mrb[2].mxu0 %v27_v24  ;;  %v590_v24 = vld [vmem:[%s1696_s3 + $0x38] sm:$0xff]  ;;  %v1424_v34 = vpack.c.bf16 %v596_v33, %v595_v32  ;;  %v1454_v43 = vpack.c.bf16 %v602_v42, %v601_v41 }
  0x29   :  { %162 = vmatprep.mubr.f32.mxu0 %v1005_v3  ;;  %v1394_v25 = vpack.c.bf16 %v590_v24, %v589_v23 }
  0x2a   :  { %924 = vmatpush1.bf16.msra.mxu1 %v923_v39  ;;  %946 = vmatpush1.bf16.msra.mxu0 %v1374_v19  ;;  %v600_v39 = vld [vmem:[%s1696_s3 + $0x88] sm:$0xff] }
  0x2b   :  { %926 = vmatprep.subr.bf16.mxu1 %v925_v40  ;;  %947 = vmatprep.subr.bf16.mxu0 %v1006_v13 }
  0x2c   :  { %163 = vmatmul.mubr.f32.gmra.mrb[4].mxu0 %v28_v31  ;;  %v1414_v31 = vpack.c.bf16 %v594_v30, %v593_v29 }
  0x2d   :  { %168 = vmatprep.mubr.f32.mxu0 %v1005_v3 }
  0x2e   :  { %928 = vmatpush1.bf16.msra.mxu1 %v927_v46  ;;  %949 = vmatpush1.bf16.msra.mxu0 %v1384_v22 }
  0x2f   :  { %930 = vmatprep.subr.bf16.mxu1 %v929_v47  ;;  %950 = vmatprep.subr.bf16.mxu0 %v1006_v13  ;;  %v76_v47 = vlaneseq }
  0x30   :  { %169 = vmatmul.mubr.f32.gmra.mrb[6].mxu0 %v29_v38  ;;  %v599_v38 = vld [vmem:[%s1696_s3 + $0x80] sm:$0xff] }
  0x31   :  { %174 = vmatprep.mubr.f32.mxu0 %v1005_v3  ;;  %v1444_v40 = vpack.c.bf16 %v600_v39, %v599_v38  ;;  %v1469_v48 = vshrl.u32 %v76_v47, 7 }
  0x32   :  { %932 = vmatpush1.bf16.msra.mxu1 %v931_v53  ;;  %952 = vmatpush1.bf16.msra.mxu0 %v1394_v25 }
  0x33   :  { %934 = vmatprep.subr.bf16.mxu1 %v933_v54  ;;  %953 = vmatprep.subr.bf16.mxu0 %v1006_v13  ;;  %v78_v49 = vsub.s32 0, %v1469_v48  ;;  %v82_v51 = vsub.s32 1, %v1469_v48 }
  0x34   :  { %175 = vmatmul.mubr.f32.gmra.mrb[8].mxu0 %v30_v45  ;;  %v604_v45 = vld [vmem:[%s1696_s3 + $0xa8] sm:$0xff] }
  0x35   :  { %180 = vmatprep.mubr.f32.mxu0 %v1005_v3  ;;  %v1464_v46 = vpack.c.bf16 %v604_v45, %v603_v44  ;;  %v1482_v53 = vrot.slane %v74_v50, %v82_v51 }
  0x36   :  { %936 = vmatpush1.bf16.msra.mxu1 %v935_v58  ;;  %955 = vmatpush1.bf16.msra.mxu0 %v1404_v28 }
  0x37   :  { %938 = vmatprep.subr.bf16.mxu1 %v937_v7  ;;  %956 = vmatprep.subr.bf16.mxu0 %v1006_v13 }
  0x38   :  { %181 = vmatmul.mubr.f32.gmra.mrb[10].mxu0 %v31_v52  ;;  %v1478_v52 = vrot.slane %v74_v50, %v78_v49 }
  0x39   :  { %186 = vmatprep.mubr.f32.mxu0 %v1005_v3 }
  0x3a   :  { %940 = vmatpush1.bf16.msra.mxu1 %v939_v10  ;;  %958 = vmatpush1.bf16.msra.mxu0 %v1414_v31 }
  0x3b   :  { %438 = vmatprep.subr.mxu1 %v328_v11  ;;  %959 = vmatprep.subr.bf16.mxu0 %v1006_v13 }
  0x3c   :  { %187 = vmatmul.mubr.f32.gmra.mrb[12].mxu0 %v32_v57 }
  0x3d   :  { %192 = vmatprep.mubr.f32.mxu0 %v1005_v3 }
  0x3e   :  { %439 = vmatpush1.msra.mxu1 %v327_v12  ;;  %961 = vmatpush1.bf16.msra.mxu0 %v1424_v34 }
  0x3f   :  { %977 = vmatprep.subr.bf16.mxu1 %v1006_v13  ;;  %962 = vmatprep.subr.bf16.mxu0 %v1006_v13 }
  0x40   :  { %193 = vmatmul.mubr.f32.gmra.mrb[14].mxu0 %v33_v59 }
  0x41   :  { %198 = vmatprep.mubr.f32.mxu0 %v1005_v3 }
  0x42   :  { %964 = vmatpush1.bf16.msra.mxu0 %v1434_v37 }
  0x43   :  { %965 = vmatprep.subr.bf16.mxu0 %v1006_v13 }
  0x44   :  { %199 = vmatmul.mubr.f32.gmra.mrb[16].mxu0 %v34_v60 }
  0x45   :  { %204 = vmatprep.mubr.f32.mxu0 %v1005_v3 }
  0x46   :  { %967 = vmatpush1.bf16.msra.mxu0 %v1444_v40 }
  0x47   :  { %968 = vmatprep.subr.bf16.mxu0 %v1006_v13 }
  0x48   :  { %205 = vmatmul.mubr.f32.gmra.mrb[18].mxu0 %v35_v61 }
  0x49   :  { %210 = vmatprep.mubr.f32.mxu0 %v1005_v3 }
  0x4a   :  { %970 = vmatpush1.bf16.msra.mxu0 %v1454_v43 }
  0x4b   :  { %971 = vmatprep.subr.bf16.mxu0 %v1006_v13 }
  0x4c   :  { %211 = vmatmul.mubr.f32.gmra.mrb[20].mxu0 %v36_v62 }
  0x4d   :  { %216 = vmatprep.mubr.f32.mxu0 %v1005_v3 }
  0x4e   :  { %973 = vmatpush1.bf16.msra.mxu0 %v1464_v46 }
  0x4f   :  { %974 = vmatprep.subr.bf16.mxu0 %v1006_v13 }
  0x50   :  { %217 = vmatmul.mubr.f32.gmra.mrb[22].mxu0 %v37_v63 }
  0x51   :  { %222 = vmatprep.mubr.f32.mxu0 %v1005_v3 }
  0x54   :  { %223 = vmatmul.mubr.f32.gmra.mrb[24].mxu0 %v38_v0 }
  0x55   :  { %228 = vmatprep.mubr.f32.mxu0 %v1005_v3 }
  0x58   :  { %229 = vmatmul.mubr.f32.gmra.mrb[26].mxu0 %v39_v1 }
  0x59   :  { %234 = vmatprep.mubr.f32.mxu0 %v1005_v3 }
  0x5c   :  { %235 = vmatmul.mubr.f32.gmra.mrb[28].mxu0 %v40_v2 }
  0x5d   :  { %240 = vmatprep.mubr.f32.mxu0 %v1005_v3 }
  0x60   :  { %241 = vmatmul.mubr.f32.gmra.mrb[30].mxu0 %v41_v4 }
  0xf7   :  { %v152_v54 = vpop.f32.mrb[0].mxu0 }
  0xf8   :  { %v153_v55 = vadd.f32 %v152_v54, %v1478_v52  ;;  %v154_v56 = vpop.f32.mrb[1].mxu0 }
  0xf9   :  { %v155_v57 = vadd.f32 %v154_v56, %v1482_v53 }
  0xfa   :  { %v247_v60 = vmax.f32 %v153_v55, 0.0 }
  0xfb   :  { %v248_v58 = vmax.f32 %v155_v57, 0.0  ;;  %v158_v59 = vpop.f32.mrb[2].mxu0 }
  0xfc   :  { %v159_v61 = vadd.f32 %v158_v59, %v1478_v52  ;;  %v160_v62 = vpop.f32.mrb[3].mxu0 }
  0xfd   :  { %v161_v63 = vadd.f32 %v160_v62, %v1482_v53  ;;  %828 = vmatprep.mubr.msk.f32.mxu1 %vm341_vm0, %v248_v58 }
  0xfe   :  { %455 = vmatmul.mubr.f32.vlgmr.msra.gmra.mrb[0].mxu1 %v247_v60  ;;  %v249_v2 = vmax.f32 %v159_v61, 0.0 }
  0xff   :  { %v250_v0 = vmax.f32 %v161_v63, 0.0  ;;  %v164_v1 = vpop.f32.mrb[4].mxu0  ;;  %990 = vmatpush1.bf16.msra.mxu1 %v1368_v17 }
 0x100   :  { %v165_v4 = vadd.f32 %v164_v1, %v1478_v52  ;;  %v166_v5 = vpop.f32.mrb[5].mxu0  ;;  %978 = vmatprep.subr.bf16.mxu1 %v1006_v13 }
 0x101   :  { %v167_v6 = vadd.f32 %v166_v5, %v1482_v53  ;;  %829 = vmatprep.mubr.msk.f32.mxu1 %vm341_vm0, %v250_v0 }
 0x102   :  { %461 = vmatmul.mubr.f32.gmra.mrb[2].mxu1 %v249_v2  ;;  %v251_v9 = vmax.f32 %v165_v4, 0.0 }
 0x103   :  { %v252_v7 = vmax.f32 %v167_v6, 0.0  ;;  %v170_v8 = vpop.f32.mrb[6].mxu0  ;;  %991 = vmatpush1.bf16.msra.mxu1 %v1374_v19 }
 0x104   :  { %v171_v10 = vadd.f32 %v170_v8, %v1478_v52  ;;  %v172_v11 = vpop.f32.mrb[7].mxu0  ;;  %979 = vmatprep.subr.bf16.mxu1 %v1006_v13 }
 0x105   :  { %v173_v12 = vadd.f32 %v172_v11, %v1482_v53  ;;  %830 = vmatprep.mubr.msk.f32.mxu1 %vm341_vm0, %v252_v7 }
 0x106   :  { %467 = vmatmul.mubr.f32.gmra.mrb[4].mxu1 %v251_v9  ;;  %v253_v16 = vmax.f32 %v171_v10, 0.0 }
 0x107   :  { %v254_v14 = vmax.f32 %v173_v12, 0.0  ;;  %v176_v15 = vpop.f32.mrb[8].mxu0  ;;  %992 = vmatpush1.bf16.msra.mxu1 %v1384_v22 }
 0x108   :  { %v177_v17 = vadd.f32 %v176_v15, %v1478_v52  ;;  %v178_v18 = vpop.f32.mrb[9].mxu0  ;;  %980 = vmatprep.subr.bf16.mxu1 %v1006_v13 }
 0x109   :  { %v179_v19 = vadd.f32 %v178_v18, %v1482_v53  ;;  %831 = vmatprep.mubr.msk.f32.mxu1 %vm341_vm0, %v254_v14 }
 0x10a   :  { %473 = vmatmul.mubr.f32.gmra.mrb[6].mxu1 %v253_v16  ;;  %v255_v23 = vmax.f32 %v177_v17, 0.0 }
 0x10b   :  { %v256_v20 = vmax.f32 %v179_v19, 0.0  ;;  %v182_v21 = vpop.f32.mrb[10].mxu0  ;;  %993 = vmatpush1.bf16.msra.mxu1 %v1394_v25 }
 0x10c   :  { %v183_v24 = vadd.f32 %v182_v21, %v1478_v52  ;;  %v184_v26 = vpop.f32.mrb[11].mxu0  ;;  %981 = vmatprep.subr.bf16.mxu1 %v1006_v13 }
 0x10d   :  { %v185_v22 = vadd.f32 %v184_v26, %v1482_v53  ;;  %832 = vmatprep.mubr.msk.f32.mxu1 %vm341_vm0, %v256_v20 }
 0x10e   :  { %479 = vmatmul.mubr.f32.gmra.mrb[8].mxu1 %v255_v23  ;;  %v257_v30 = vmax.f32 %v183_v24, 0.0 }
 0x10f   :  { %v258_v27 = vmax.f32 %v185_v22, 0.0  ;;  %v188_v29 = vpop.f32.mrb[12].mxu0  ;;  %994 = vmatpush1.bf16.msra.mxu1 %v1404_v28 }
 0x110   :  { %v189_v32 = vadd.f32 %v188_v29, %v1478_v52  ;;  %v190_v33 = vpop.f32.mrb[13].mxu0  ;;  %982 = vmatprep.subr.bf16.mxu1 %v1006_v13 }
 0x111   :  { %v191_v25 = vadd.f32 %v190_v33, %v1482_v53  ;;  %833 = vmatprep.mubr.msk.f32.mxu1 %vm341_vm0, %v258_v27  ;;  %v605_v33 = vld [vmem:[%s1696_s3 + $0xb0] sm:$0xff] }
 0x112   :  { %485 = vmatmul.mubr.f32.gmra.mrb[10].mxu1 %v257_v30  ;;  %v259_v38 = vmax.f32 %v189_v32, 0.0 }
 0x113   :  { %v260_v35 = vmax.f32 %v191_v25, 0.0  ;;  %v194_v36 = vpop.f32.mrb[14].mxu0  ;;  %995 = vmatpush1.bf16.msra.mxu1 %v1414_v31  ;;  %v606_v25 = vld [vmem:[%s1696_s3 + $0xb8] sm:$0xff] }
 0x114   :  { %v195_v39 = vadd.f32 %v194_v36, %v1478_v52  ;;  %v196_v41 = vpop.f32.mrb[15].mxu0  ;;  %983 = vmatprep.subr.bf16.mxu1 %v1006_v13 }
 0x115   :  { %v197_v28 = vadd.f32 %v196_v41, %v1482_v53  ;;  %834 = vmatprep.mubr.msk.f32.mxu1 %vm341_vm0, %v260_v35  ;;  %v329_v35 = vld [vmem:[%s1698_s5] sm:$0x3] }
 0x116   :  { %491 = vmatmul.mubr.f32.gmra.mrb[12].mxu1 %v259_v38  ;;  %v261_v45 = vmax.f32 %v195_v39, 0.0  ;;  %v1570_v36 = vrot.slane %v329_v35, %v78_v49  ;;  %v1574_v38 = vrot.slane %v329_v35, %v82_v51 }
 0x117   :  { %v262_v42 = vmax.f32 %v197_v28, 0.0  ;;  %v200_v44 = vpop.f32.mrb[16].mxu0  ;;  %996 = vmatpush1.bf16.msra.mxu1 %v1424_v34 }
 0x118   :  { %v201_v47 = vadd.f32 %v200_v44, %v1478_v52  ;;  %v202_v50 = vpop.f32.mrb[17].mxu0  ;;  %984 = vmatprep.subr.bf16.mxu1 %v1006_v13 }
 0x119   :  { %v203_v31 = vadd.f32 %v202_v50, %v1482_v53  ;;  %835 = vmatprep.mubr.msk.f32.mxu1 %vm341_vm0, %v262_v42 }
 0x11a   :  { %497 = vmatmul.mubr.f32.gmra.mrb[14].mxu1 %v261_v45  ;;  %v263_v56 = vmax.f32 %v201_v47, 0.0 }
 0x11b   :  { %v264_v54 = vmax.f32 %v203_v31, 0.0  ;;  %v206_v55 = vpop.f32.mrb[18].mxu0  ;;  %997 = vmatpush1.bf16.msra.mxu1 %v1434_v37 }
 0x11c   :  { %v207_v57 = vadd.f32 %v206_v55, %v1478_v52  ;;  %v208_v58 = vpop.f32.mrb[19].mxu0  ;;  %985 = vmatprep.subr.bf16.mxu1 %v1006_v13 }
 0x11d   :  { %v209_v34 = vadd.f32 %v208_v58, %v1482_v53  ;;  %836 = vmatprep.mubr.msk.f32.mxu1 %vm341_vm0, %v264_v54 }
 0x11e   :  { %503 = vmatmul.mubr.f32.gmra.mrb[16].mxu1 %v263_v56  ;;  %v265_v61 = vmax.f32 %v207_v57, 0.0 }
 0x11f   :  { %v266_v59 = vmax.f32 %v209_v34, 0.0  ;;  %v212_v60 = vpop.f32.mrb[20].mxu0  ;;  %998 = vmatpush1.bf16.msra.mxu1 %v1444_v40 }
 0x120   :  { %v213_v62 = vadd.f32 %v212_v60, %v1478_v52  ;;  %v214_v63 = vpop.f32.mrb[21].mxu0  ;;  %986 = vmatprep.subr.bf16.mxu1 %v1006_v13 }
 0x121   :  { %v215_v37 = vadd.f32 %v214_v63, %v1482_v53  ;;  %837 = vmatprep.mubr.msk.f32.mxu1 %vm341_vm0, %v266_v59 }
 0x122   :  { %509 = vmatmul.mubr.f32.gmra.mrb[18].mxu1 %v265_v61  ;;  %v267_v2 = vmax.f32 %v213_v62, 0.0 }
 0x123   :  { %v268_v0 = vmax.f32 %v215_v37, 0.0  ;;  %v218_v1 = vpop.f32.mrb[22].mxu0  ;;  %999 = vmatpush1.bf16.msra.mxu1 %v1454_v43 }
 0x124   :  { %v219_v4 = vadd.f32 %v218_v1, %v1478_v52  ;;  %v220_v5 = vpop.f32.mrb[23].mxu0  ;;  %987 = vmatprep.subr.bf16.mxu1 %v1006_v13 }
 0x125   :  { %v221_v40 = vadd.f32 %v220_v5, %v1482_v53  ;;  %838 = vmatprep.mubr.msk.f32.mxu1 %vm341_vm0, %v268_v0 }
 0x126   :  { %515 = vmatmul.mubr.f32.gmra.mrb[20].mxu1 %v267_v2  ;;  %v269_v8 = vmax.f32 %v219_v4, 0.0 }
 0x127   :  { %v270_v6 = vmax.f32 %v221_v40, 0.0  ;;  %v224_v7 = vpop.f32.mrb[24].mxu0  ;;  %1000 = vmatpush1.bf16.msra.mxu1 %v1464_v46 }
 0x128   :  { %v225_v9 = vadd.f32 %v224_v7, %v1478_v52  ;;  %v226_v10 = vpop.f32.mrb[25].mxu0  ;;  %988 = vmatprep.subr.bf16.mxu1 %v1006_v13 }
 0x129   :  { %v227_v43 = vadd.f32 %v226_v10, %v1482_v53  ;;  %839 = vmatprep.mubr.msk.f32.mxu1 %vm341_vm0, %v270_v6 }
 0x12a   :  { %521 = vmatmul.mubr.f32.gmra.mrb[22].mxu1 %v269_v8  ;;  %v271_v14 = vmax.f32 %v225_v9, 0.0 }
 0x12b   :  { %v272_v11 = vmax.f32 %v227_v43, 0.0  ;;  %v230_v12 = vpop.f32.mrb[26].mxu0 }
 0x12c   :  { %v231_v15 = vadd.f32 %v230_v12, %v1478_v52  ;;  %v232_v16 = vpop.f32.mrb[27].mxu0 }
 0x12d   :  { %v233_v17 = vadd.f32 %v232_v16, %v1482_v53  ;;  %840 = vmatprep.mubr.msk.f32.mxu1 %vm341_vm0, %v272_v11 }
 0x12e   :  { %527 = vmatmul.mubr.f32.gmra.mrb[24].mxu1 %v271_v14  ;;  %v273_v19 = vmax.f32 %v231_v15, 0.0 }
 0x12f   :  { %v274_v46 = vmax.f32 %v233_v17, 0.0  ;;  %v236_v18 = vpop.f32.mrb[28].mxu0 }
 0x130   :  { %v237_v13 = vadd.f32 %v236_v18, %v1478_v52  ;;  %v238_v20 = vpop.f32.mrb[29].mxu0 }
 0x131   :  { %v239_v21 = vadd.f32 %v238_v20, %v1482_v53  ;;  %841 = vmatprep.mubr.msk.f32.mxu1 %vm341_vm0, %v274_v46 }
 0x132   :  { %533 = vmatmul.mubr.f32.gmra.mrb[26].mxu1 %v273_v19  ;;  %v275_v26 = vmax.f32 %v237_v13, 0.0 }
 0x133   :  { %v276_v23 = vmax.f32 %v239_v21, 0.0  ;;  %v242_v24 = vpop.f32.mrb[30].mxu0 }
 0x134   :  { %v243_v22 = vadd.f32 %v242_v24, %v1478_v52  ;;  %v244_v27 = vpop.f32.mrb[31].mxu0  ;;  %v975_v52 = vpack.c.bf16 %v606_v25, %v605_v33 }
 0x135   :  { %v245_v29 = vadd.f32 %v244_v27, %v1482_v53  ;;  %842 = vmatprep.mubr.msk.f32.mxu1 %vm341_vm0, %v276_v23  ;;  %v607_v53 = vld [vmem:[%s1696_s3 + $0xc0] sm:$0xff] }
 0x136   :  { %539 = vmatmul.mubr.f32.gmra.mrb[28].mxu1 %v275_v26  ;;  %v277_v32 = vmax.f32 %v243_v22, 0.0  ;;  %976 = vmatpush1.bf16.msra.mxu0 %v975_v52 }
 0x137   :  { %v278_v30 = vmax.f32 %v245_v29, 0.0  ;;  %1001 = vmatpush1.bf16.msra.mxu1 %v975_v52  ;;  %711 = vmatprep.subr.mxu0 %v1005_v3 }
 0x138   :  { %989 = vmatprep.subr.mxu1 %v1005_v3 }
 0x139   :  { %843 = vmatprep.mubr.msk.f32.mxu1 %vm341_vm0, %v278_v30 }
 0x13a   :  { %545 = vmatmul.mubr.f32.gmra.mrb[30].mxu1 %v277_v32  ;;  %712 = vmatpush1.msra.mxu0 %v607_v53 }
 0x13b   :  { %1002 = vmatpush1.msra.mxu1 %v607_v53 }
 0x1d1   :  { %v456_v39 = vpop.f32.mrb[0].mxu1 }
 0x1d2   :  { %v457_v3 = vadd.f32 %v456_v39, %v1570_v36  ;;  %v458_v41 = vpop.f32.mrb[1].mxu1 }
 0x1d3   :  { %v459_v28 = vadd.f32 %v458_v41, %v1574_v38 }
 0x1d4   :  { %v551_v45 = vmax.f32 %v457_v3, 0.0 }
 0x1d5   :  { %v552_v42 = vmax.f32 %v459_v28, 0.0  ;;  %v462_v44 = vpop.f32.mrb[2].mxu1 }
 0x1d6   :  { %v463_v47 = vadd.f32 %v462_v44, %v1570_v36  ;;  %v464_v50 = vpop.f32.mrb[3].mxu1 }
 0x1d7   :  { %v465_v31 = vadd.f32 %v464_v50, %v1574_v38  ;;  %845 = vmatprep.mubr.msk.f32.mxu0 %vm341_vm0, %v552_v42 }
 0x1d8   :  { %728 = vmatmul.mubr.f32.vlgmr.msra.gmra.mrb[32].mxu0 %v551_v45  ;;  %v553_v51 = vmax.f32 %v463_v47, 0.0 }
 0x1d9   :  { %v554_v48 = vmax.f32 %v465_v31, 0.0  ;;  %v468_v49 = vpop.f32.mrb[4].mxu1 }
 0x1da   :  { %v469_v54 = vadd.f32 %v468_v49, %v1570_v36  ;;  %v470_v55 = vpop.f32.mrb[5].mxu1 }
 0x1db   :  { %v471_v56 = vadd.f32 %v470_v55, %v1574_v38  ;;  %846 = vmatprep.mubr.msk.f32.mxu0 %vm341_vm0, %v554_v48 }
 0x1dc   :  { %733 = vmatmul.mubr.f32.gmra.mrb[34].mxu0 %v553_v51  ;;  %v555_v34 = vmax.f32 %v469_v54, 0.0 }
 0x1dd   :  { %v556_v57 = vmax.f32 %v471_v56, 0.0  ;;  %v474_v58 = vpop.f32.mrb[6].mxu1 }
 0x1de   :  { %v475_v59 = vadd.f32 %v474_v58, %v1570_v36  ;;  %v476_v60 = vpop.f32.mrb[7].mxu1 }
 0x1df   :  { %v477_v61 = vadd.f32 %v476_v60, %v1574_v38  ;;  %847 = vmatprep.mubr.msk.f32.mxu0 %vm341_vm0, %v556_v57 }
 0x1e0   :  { %738 = vmatmul.mubr.f32.gmra.mrb[36].mxu0 %v555_v34  ;;  %v557_v37 = vmax.f32 %v475_v59, 0.0 }
 0x1e1   :  { %v558_v62 = vmax.f32 %v477_v61, 0.0  ;;  %v480_v63 = vpop.f32.mrb[8].mxu1 }
 0x1e2   :  { %v481_v0 = vadd.f32 %v480_v63, %v1570_v36  ;;  %v482_v1 = vpop.f32.mrb[9].mxu1 }
 0x1e3   :  { %v483_v2 = vadd.f32 %v482_v1, %v1574_v38  ;;  %848 = vmatprep.mubr.msk.f32.mxu0 %vm341_vm0, %v558_v62 }
 0x1e4   :  { %743 = vmatmul.mubr.f32.gmra.mrb[38].mxu0 %v557_v37  ;;  %v559_v40 = vmax.f32 %v481_v0, 0.0 }
 0x1e5   :  { %v560_v4 = vmax.f32 %v483_v2, 0.0  ;;  %v486_v5 = vpop.f32.mrb[10].mxu1 }
 0x1e6   :  { %v487_v6 = vadd.f32 %v486_v5, %v1570_v36  ;;  %v488_v7 = vpop.f32.mrb[11].mxu1 }
 0x1e7   :  { %v489_v8 = vadd.f32 %v488_v7, %v1574_v38  ;;  %849 = vmatprep.mubr.msk.f32.mxu0 %vm341_vm0, %v560_v4 }
 0x1e8   :  { %748 = vmatmul.mubr.f32.gmra.mrb[40].mxu0 %v559_v40  ;;  %v561_v43 = vmax.f32 %v487_v6, 0.0 }
 0x1e9   :  { %v562_v9 = vmax.f32 %v489_v8, 0.0  ;;  %v492_v10 = vpop.f32.mrb[12].mxu1 }
 0x1ea   :  { %v493_v11 = vadd.f32 %v492_v10, %v1570_v36  ;;  %v494_v12 = vpop.f32.mrb[13].mxu1 }
 0x1eb   :  { %v495_v14 = vadd.f32 %v494_v12, %v1574_v38  ;;  %850 = vmatprep.mubr.msk.f32.mxu0 %vm341_vm0, %v562_v9  ;;  %v1627_v9 = vld [vmem:[%s1699_s6] ss:$0 sm:$0xff] }
 0x1ec   :  { %753 = vmatmul.mubr.f32.gmra.mrb[42].mxu0 %v561_v43  ;;  %v563_v17 = vmax.f32 %v493_v11, 0.0 }
 0x1ed   :  { %v564_v15 = vmax.f32 %v495_v14, 0.0  ;;  %v498_v16 = vpop.f32.mrb[14].mxu1 }
 0x1ee   :  { %v499_v46 = vadd.f32 %v498_v16, %v1570_v36  ;;  %v500_v18 = vpop.f32.mrb[15].mxu1 }
 0x1ef   :  { %v501_v19 = vadd.f32 %v500_v18, %v1574_v38  ;;  %851 = vmatprep.mubr.msk.f32.mxu0 %vm341_vm0, %v564_v15 }
 0x1f0   :  { %758 = vmatmul.mubr.f32.gmra.mrb[44].mxu0 %v563_v17  ;;  %v565_v21 = vmax.f32 %v499_v46, 0.0 }
 0x1f1   :  { %v566_v13 = vmax.f32 %v501_v19, 0.0  ;;  %v504_v20 = vpop.f32.mrb[16].mxu1 }
 0x1f2   :  { %v505_v23 = vadd.f32 %v504_v20, %v1570_v36  ;;  %v506_v24 = vpop.f32.mrb[17].mxu1 }
 0x1f3   :  { %v507_v26 = vadd.f32 %v506_v24, %v1574_v38  ;;  %852 = vmatprep.mubr.msk.f32.mxu0 %vm341_vm0, %v566_v13 }
 0x1f4   :  { %763 = vmatmul.mubr.f32.gmra.mrb[46].mxu0 %v565_v21  ;;  %v567_v29 = vmax.f32 %v505_v23, 0.0 }
 0x1f5   :  { %v568_v22 = vmax.f32 %v507_v26, 0.0  ;;  %v510_v27 = vpop.f32.mrb[18].mxu1 }
 0x1f6   :  { %v511_v30 = vadd.f32 %v510_v27, %v1570_v36  ;;  %v512_v32 = vpop.f32.mrb[19].mxu1 }
 0x1f7   :  { %v513_v33 = vadd.f32 %v512_v32, %v1574_v38  ;;  %853 = vmatprep.mubr.msk.f32.mxu0 %vm341_vm0, %v568_v22 }
 0x1f8   :  { %768 = vmatmul.mubr.f32.gmra.mrb[48].mxu0 %v567_v29  ;;  %v569_v53 = vmax.f32 %v511_v30, 0.0 }
 0x1f9   :  { %v570_v25 = vmax.f32 %v513_v33, 0.0  ;;  %v516_v52 = vpop.f32.mrb[20].mxu1 }
 0x1fa   :  { %v517_v35 = vadd.f32 %v516_v52, %v1570_v36  ;;  %v518_v39 = vpop.f32.mrb[21].mxu1 }
 0x1fb   :  { %v519_v3 = vadd.f32 %v518_v39, %v1574_v38  ;;  %854 = vmatprep.mubr.msk.f32.mxu0 %vm341_vm0, %v570_v25 }
 0x1fc   :  { %773 = vmatmul.mubr.f32.gmra.mrb[50].mxu0 %v569_v53  ;;  %v571_v42 = vmax.f32 %v517_v35, 0.0 }
 0x1fd   :  { %v572_v41 = vmax.f32 %v519_v3, 0.0  ;;  %v522_v28 = vpop.f32.mrb[22].mxu1 }
 0x1fe   :  { %v523_v44 = vadd.f32 %v522_v28, %v1570_v36  ;;  %v524_v45 = vpop.f32.mrb[23].mxu1 }
 0x1ff   :  { %v525_v47 = vadd.f32 %v524_v45, %v1574_v38  ;;  %855 = vmatprep.mubr.msk.f32.mxu0 %vm341_vm0, %v572_v41 }
 0x200   :  { %778 = vmatmul.mubr.f32.gmra.mrb[52].mxu0 %v571_v42  ;;  %v573_v48 = vmax.f32 %v523_v44, 0.0 }
 0x201   :  { %v574_v50 = vmax.f32 %v525_v47, 0.0  ;;  %v528_v31 = vpop.f32.mrb[24].mxu1 }
 0x202   :  { %v529_v49 = vadd.f32 %v528_v31, %v1570_v36  ;;  %v530_v51 = vpop.f32.mrb[25].mxu1 }
 0x203   :  { %v531_v54 = vadd.f32 %v530_v51, %v1574_v38  ;;  %856 = vmatprep.mubr.msk.f32.mxu1 %vm341_vm0, %v574_v50 }
 0x204   :  { %783 = vmatmul.mubr.f32.vlgmr.msra.gmra.mrb[32].mxu1 %v573_v48  ;;  %v575_v57 = vmax.f32 %v529_v49, 0.0 }
 0x205   :  { %v576_v55 = vmax.f32 %v531_v54, 0.0  ;;  %v534_v56 = vpop.f32.mrb[26].mxu1 }
 0x206   :  { %v535_v58 = vadd.f32 %v534_v56, %v1570_v36  ;;  %v536_v34 = vpop.f32.mrb[27].mxu1 }
 0x207   :  { %v537_v59 = vadd.f32 %v536_v34, %v1574_v38  ;;  %857 = vmatprep.mubr.msk.f32.mxu1 %vm341_vm0, %v576_v55 }
 0x208   :  { %788 = vmatmul.mubr.f32.gmra.mrb[34].mxu1 %v575_v57  ;;  %v577_v62 = vmax.f32 %v535_v58, 0.0 }
 0x209   :  { %v578_v60 = vmax.f32 %v537_v59, 0.0  ;;  %v540_v61 = vpop.f32.mrb[28].mxu1 }
 0x20a   :  { %v541_v63 = vadd.f32 %v540_v61, %v1570_v36  ;;  %v542_v37 = vpop.f32.mrb[29].mxu1 }
 0x20b   :  { %v543_v0 = vadd.f32 %v542_v37, %v1574_v38  ;;  %858 = vmatprep.mubr.msk.f32.mxu1 %vm341_vm0, %v578_v60 }
 0x20c   :  { %793 = vmatmul.mubr.f32.gmra.mrb[36].mxu1 %v577_v62  ;;  %v579_v4 = vmax.f32 %v541_v63, 0.0 }
 0x20d   :  { %v580_v1 = vmax.f32 %v543_v0, 0.0  ;;  %v546_v2 = vpop.f32.mrb[30].mxu1 }
 0x20e   :  { %v547_v5 = vadd.f32 %v546_v2, %v1570_v36  ;;  %v548_v40 = vpop.f32.mrb[31].mxu1 }
 0x20f   :  { %v549_v6 = vadd.f32 %v548_v40, %v1574_v38  ;;  %859 = vmatprep.mubr.msk.f32.mxu1 %vm341_vm0, %v580_v1 }
 0x210   :  { %798 = vmatmul.mubr.f32.gmra.mrb[38].mxu1 %v579_v4  ;;  %v581_v8 = vmax.f32 %v547_v5, 0.0 }
 0x211   :  { %v582_v7 = vmax.f32 %v549_v6, 0.0 }
 0x213   :  { %860 = vmatprep.mubr.msk.f32.mxu1 %vm341_vm0, %v582_v7 }
 0x214   :  { %803 = vmatmul.mubr.f32.gmra.mrb[40].mxu1 %v581_v8 }
 0x2ab   :  { %v729_v10 = vpop.f32.mrb[32].mxu0 }
 0x2ac   :  { %v730_v43 = vadd.f32 %v1627_v9, %v729_v10  ;;  %v731_v36 = vpop.f32.mrb[33].mxu0 }
 0x2ae   :  { %808 = vst [vmem:[%s1700_s7] sm:$0xff] %v730_v43 }
 0x2af   :  { %v734_v38 = vpop.f32.mrb[34].mxu0 }
 0x2b0   :  { %v735_v11 = vadd.f32 %v1627_v9, %v734_v38  ;;  %v736_v12 = vpop.f32.mrb[35].mxu0 }
 0x2b2   :  { %809 = vst [vmem:[%s1700_s7 + $0x8] sm:$0xff] %v735_v11 }
 0x2b3   :  { %v739_v14 = vpop.f32.mrb[36].mxu0 }
 0x2b4   :  { %v740_v15 = vadd.f32 %v1627_v9, %v739_v14  ;;  %v741_v16 = vpop.f32.mrb[37].mxu0 }
 0x2b6   :  { %810 = vst [vmem:[%s1700_s7 + $0x10] sm:$0xff] %v740_v15 }
 0x2b7   :  { %v744_v17 = vpop.f32.mrb[38].mxu0 }
 0x2b8   :  { %v745_v46 = vadd.f32 %v1627_v9, %v744_v17  ;;  %v746_v18 = vpop.f32.mrb[39].mxu0 }
 0x2ba   :  { %811 = vst [vmem:[%s1700_s7 + $0x18] sm:$0xff] %v745_v46 }
 0x2bb   :  { %v749_v19 = vpop.f32.mrb[40].mxu0 }
 0x2bc   :  { %v750_v13 = vadd.f32 %v1627_v9, %v749_v19  ;;  %v751_v20 = vpop.f32.mrb[41].mxu0 }
 0x2be   :  { %812 = vst [vmem:[%s1700_s7 + $0x20] sm:$0xff] %v750_v13 }
 0x2bf   :  { %v754_v21 = vpop.f32.mrb[42].mxu0 }
 0x2c0   :  { %v755_v23 = vadd.f32 %v1627_v9, %v754_v21  ;;  %v756_v24 = vpop.f32.mrb[43].mxu0 }
 0x2c2   :  { %813 = vst [vmem:[%s1700_s7 + $0x28] sm:$0xff] %v755_v23 }
 0x2c3   :  { %v759_v26 = vpop.f32.mrb[44].mxu0 }
 0x2c4   :  { %v760_v22 = vadd.f32 %v1627_v9, %v759_v26  ;;  %v761_v27 = vpop.f32.mrb[45].mxu0 }
 0x2c6   :  { %814 = vst [vmem:[%s1700_s7 + $0x30] sm:$0xff] %v760_v22 }
 0x2c7   :  { %v764_v29 = vpop.f32.mrb[46].mxu0 }
 0x2c8   :  { %v765_v30 = vadd.f32 %v1627_v9, %v764_v29  ;;  %v766_v32 = vpop.f32.mrb[47].mxu0 }
 0x2ca   :  { %815 = vst [vmem:[%s1700_s7 + $0x38] sm:$0xff] %v765_v30 }
 0x2cb   :  { %v769_v33 = vpop.f32.mrb[48].mxu0 }
 0x2cc   :  { %v770_v25 = vadd.f32 %v1627_v9, %v769_v33  ;;  %v771_v52 = vpop.f32.mrb[49].mxu0 }
 0x2ce   :  { %816 = vst [vmem:[%s1700_s7 + $0x40] sm:$0xff] %v770_v25 }
 0x2cf   :  { %v774_v53 = vpop.f32.mrb[50].mxu0 }
 0x2d0   :  { %v775_v35 = vadd.f32 %v1627_v9, %v774_v53  ;;  %v776_v39 = vpop.f32.mrb[51].mxu0 }
 0x2d2   :  { %817 = vst [vmem:[%s1700_s7 + $0x48] sm:$0xff] %v775_v35 }
 0x2d3   :  { %v779_v3 = vpop.f32.mrb[52].mxu0 }
 0x2d4   :  { %v780_v41 = vadd.f32 %v1627_v9, %v779_v3  ;;  %v781_v28 = vpop.f32.mrb[53].mxu0 }
 0x2d6   :  { %818 = vst [vmem:[%s1700_s7 + $0x50] sm:$0xff] %v780_v41 }
 0x2d7   :  { %v784_v42 = vpop.f32.mrb[32].mxu1 }
 0x2d8   :  { %v785_v44 = vadd.f32 %v1627_v9, %v784_v42  ;;  %v786_v45 = vpop.f32.mrb[33].mxu1 }
 0x2da   :  { %819 = vst [vmem:[%s1700_s7 + $0x58] sm:$0xff] %v785_v44 }
 0x2db   :  { %v789_v47 = vpop.f32.mrb[34].mxu1 }
 0x2dc   :  { %v790_v50 = vadd.f32 %v1627_v9, %v789_v47  ;;  %v791_v31 = vpop.f32.mrb[35].mxu1 }
 0x2de   :  { %820 = vst [vmem:[%s1700_s7 + $0x60] sm:$0xff] %v790_v50 }
 0x2df   :  { %v794_v48 = vpop.f32.mrb[36].mxu1 }
 0x2e0   :  { %v795_v49 = vadd.f32 %v1627_v9, %v794_v48  ;;  %v796_v51 = vpop.f32.mrb[37].mxu1 }
 0x2e2   :  { %821 = vst [vmem:[%s1700_s7 + $0x68] sm:$0xff] %v795_v49 }
 0x2e3   :  { %v799_v54 = vpop.f32.mrb[38].mxu1 }
 0x2e4   :  { %v800_v55 = vadd.f32 %v1627_v9, %v799_v54  ;;  %v801_v56 = vpop.f32.mrb[39].mxu1 }
 0x2e6   :  { %822 = vst [vmem:[%s1700_s7 + $0x70] sm:$0xff] %v800_v55 }
 0x2e7   :  { %v804_v57 = vpop.f32.mrb[40].mxu1 }
 0x2e8   :  { %v805_v58 = vadd.f32 %v1627_v9, %v804_v57  ;;  %v806_v34 = vpop.f32.mrb[41].mxu1 }
 0x2ea   :  { %823 = vst [vmem:[%s1700_s7 + $0x78] sm:$0xff] %v805_v58 }

</bundles_post_ra>
